<compile_context>
chip_gen: v7x
topology: tpu7x:2x2x1
jax: 0.10.0
libtpu: 0.0.40
codegen_flags: <defaults>
</compile_context>

<pallas_src>
import jax
import jax.numpy as jnp
from jax.experimental import pallas as pl
from jax.experimental.pallas import tpu as pltpu


def _srnn_kernel(x_ref, h0_ref, wx_ref, wh_ref, out_ref, h_scratch):
    """One grid step processes T_CHUNK time steps.

    x_ref   : (T_CHUNK*B, E)   flattened (time, batch) rows of X for this chunk
    h0_ref  : (B, H)           initial hidden state
    wx_ref  : (E, 2H+1)        [Wa0x | Wa1x | Wf^T]
    wh_ref  : (H, 2H)          [Wa0h | Wa1h]
    out_ref : (T_CHUNK*B, H)   flattened (time, batch) hidden outputs
    h_scratch : VMEM (B, H) f32, carried hidden state across grid steps
    """
    c = pl.program_id(0)
    B, H = h0_ref.shape
    CB = x_ref.shape[0]
    T = CB // B

    # Initialize the carried hidden state on the first chunk only.
    @pl.when(c == 0)
    def _():
        h_scratch[...] = h0_ref[...].astype(jnp.float32)

    # ---- Phase 1 (parallel over time): one fused MXU matmul for everything
    # that depends only on x: both a-projections' x-halves and the gate logit.
    xp = jnp.dot(x_ref[...], wx_ref[...],
                 preferred_element_type=jnp.float32)          # (CB, 2H+1)
    # f = round(sigmoid(logit)) == (logit > 0) strictly (sigmoid(0)=0.5 -> 0
    # under round-half-even), so no EUP sigmoid / VPU round on the hot path.
    f = xp[:, 2 * H:] > 0.0                                   # (CB, 1) bool
    bx = jnp.where(f, xp[:, H:2 * H], xp[:, :H])              # (CB, H) blended x-part

    # ---- Phase 2 (serial): only h_t @ [Wa0h | Wa1h] + blend remains on the
    # critical path.  Fully unrolled over the chunk (T is small).
    wh = wh_ref[...]
    h = h_scratch[...]
    for t in range(T):
        lo = t * B
        ah = jnp.dot(h, wh, preferred_element_type=jnp.float32)   # (B, 2H)
        h = bx[lo:lo + B, :] + jnp.where(f[lo:lo + B, :],
                                         ah[:, H:], ah[:, :H])    # (B, H)
        out_ref[lo:lo + B, :] = h.astype(out_ref.dtype)
    h_scratch[...] = h


def _pick_t_chunk(seq_len, batch, max_rows=1024):
    """Largest legal time chunk: whole sequence if small, else a divisor of S
    whose row block (t*B) is a multiple of 8 and fits the row budget."""
    if seq_len * batch <= max_rows:
        return seq_len
    best = None
    for t in range(1, seq_len + 1):
        rows = t * batch
        if seq_len % t == 0 and rows % 8 == 0 and rows <= max_rows:
            best = t
    return best if best is not None else seq_len


def stochastic_rnn_forward(X, hidden, w_f, w_a0, w_a1, t_chunk=None):
    """X: (S, B, E) f32; hidden: (1, B, H) f32 or None.

    w_f:  (1, E)        (PyTorch Linear weight, bias=False)
    w_a0: (H, E + H)
    w_a1: (H, E + H)
    Returns (layer_output (S, B, H), hidden (1, B, H)).
    """
    S, B, E = X.shape
    H = w_a0.shape[0]
    if hidden is None:
        hidden = jnp.zeros((1, B, H), dtype=X.dtype)

    # Glue: pre-transpose / fuse weights so the kernel does only two dots.
    wx = jnp.concatenate([w_a0[:, :E].T, w_a1[:, :E].T, w_f.T], axis=1)  # (E, 2H+1)
    wh = jnp.concatenate([w_a0[:, E:].T, w_a1[:, E:].T], axis=1)         # (H, 2H)

    if t_chunk is None:
        t_chunk = _pick_t_chunk(S, B)
    assert S % t_chunk == 0, "t_chunk must divide seq_len"
    assert t_chunk == S or (t_chunk * B) % 8 == 0, "row block must be 8-aligned"
    num_chunks = S // t_chunk
    CB = t_chunk * B

    X2 = X.reshape(S * B, E)   # flatten (time, batch) -> rows; free in XLA
    h0 = hidden[0]             # (B, H)

    out2 = pl.pallas_call(
        _srnn_kernel,
        out_shape=jax.ShapeDtypeStruct((S * B, H), X.dtype),
        grid_spec=pltpu.PrefetchScalarGridSpec(
            num_scalar_prefetch=0,
            grid=(num_chunks,),
            in_specs=[
                pl.BlockSpec((CB, E), lambda c: (c, 0)),          # X chunk rows
                pl.BlockSpec((B, H), lambda c: (0, 0)),           # initial hidden
                pl.BlockSpec((E, 2 * H + 1), lambda c: (0, 0)),   # fused x-weights
                pl.BlockSpec((H, 2 * H), lambda c: (0, 0)),       # fused h-weights
            ],
            out_specs=pl.BlockSpec((CB, H), lambda c: (c, 0)),    # output chunk rows
            scratch_shapes=[pltpu.VMEM((B, H), jnp.float32)],     # carried hidden
        ),
        compiler_params=pltpu.CompilerParams(
            dimension_semantics=("arbitrary",),     # time chunks carry state
            vmem_limit_bytes=32 * 1024 * 1024),
    )(X2, h0, wx, wh)

    out = out2.reshape(S, B, H)
    hfin = out[S - 1:S]        # final hidden == last layer output; no extra store
    return out, hfin


def _reference_forward(X, hidden, w_f, w_a0, w_a1):
    """Pure-JAX reference mirroring the PyTorch module exactly."""
    S, B, E = X.shape
    H = w_a0.shape[0]
    h = jnp.zeros((1, B, H), X.dtype) if hidden is None else hidden
    outs = []
    for t in range(S):
        x_t = X[t]
        f = jnp.round(jax.nn.sigmoid(x_t @ w_f.T))                 # (B, 1)
        iv = jnp.concatenate([x_t, h[0]], axis=1)                  # (B, E+H)
        h_next = f * (iv @ w_a1.T) + (1.0 - f) * (iv @ w_a0.T)     # (B, H)
        h = h_next[None]
        outs.append(h_next)
    return jnp.stack(outs, 0), h


def _init_linear_weight(key, out_features, in_features):
    # Deterministic stand-in for nn.Linear.reset_parameters (uniform(-k, k)).
    bound = 1.0 / jnp.sqrt(jnp.float32(in_features))
    return jax.random.uniform(key, (out_features, in_features),
                              dtype=jnp.float32, minval=-bound, maxval=bound)


if __name__ == "__main__":
    seq_len, batch, embed, hidden_size = 8, 2, 16, 32

    key = jax.random.PRNGKey(0)
    kx, kh, kf, k0, k1 = jax.random.split(key, 5)

    X = jax.random.normal(kx, (seq_len, batch, embed), dtype=jnp.float32)
    hidden0 = jax.random.normal(kh, (1, batch, hidden_size), dtype=jnp.float32)

    w_f = _init_linear_weight(kf, 1, embed)
    w_a0 = _init_linear_weight(k0, hidden_size, embed + hidden_size)
    w_a1 = _init_linear_weight(k1, hidden_size, embed + hidden_size)

    ref_out, ref_h = _reference_forward(X, hidden0, w_f, w_a0, w_a1)

    # Single-chunk path (whole sequence in one grid step).
    out, hfin = stochastic_rnn_forward(X, hidden0, w_f, w_a0, w_a1)
    out = jax.block_until_ready(out)
    hfin = jax.block_until_ready(hfin)
    assert out.shape == (seq_len, batch, hidden_size)
    assert hfin.shape == (1, batch, hidden_size)
    assert jnp.allclose(out, ref_out, atol=1e-5, rtol=1e-5)
    assert jnp.allclose(hfin, ref_h, atol=1e-5, rtol=1e-5)

    # Multi-chunk path (exercises the hidden-state carry across grid steps).
    out_c, hfin_c = stochastic_rnn_forward(X, hidden0, w_f, w_a0, w_a1, t_chunk=4)
    out_c = jax.block_until_ready(out_c)
    assert jnp.allclose(out_c, ref_out, atol=1e-5, rtol=1e-5)
    assert jnp.allclose(hfin_c, ref_h, atol=1e-5, rtol=1e-5)

    print("KERNEL_OK")
</pallas_src>

<mosaic_0001>
module attributes {stable_mosaic.version = 11 : i64} {
  func.func @_srnn_kernel(%arg0: i32, %arg1: memref<16x16xf32, #tpu.memory_space<vmem>>, %arg2: memref<2x32xf32, #tpu.memory_space<vmem>>, %arg3: memref<16x65xf32, #tpu.memory_space<vmem>>, %arg4: memref<32x64xf32, #tpu.memory_space<vmem>>, %arg5: memref<16x32xf32, #tpu.memory_space<vmem>>, %arg6: memref<2x32xf32, #tpu.memory_space<vmem>>) attributes {dimension_semantics = [#tpu.dimension_semantics<arbitrary>], iteration_bounds = array<i64: 1>, scalar_prefetch = 0 : i64, scratch_operands = 1 : i64, tpu.core_type = #tpu.core_type<tc>, window_params = [{transform_indices = @transform_0, window_bounds = array<i64: 16, 16>}, {pipeline_mode = #tpu.pipeline_mode<synchronous>, transform_indices = @transform_1, window_bounds = array<i64: 2, 32>}, {pipeline_mode = #tpu.pipeline_mode<synchronous>, transform_indices = @transform_2, window_bounds = array<i64: 16, 65>}, {pipeline_mode = #tpu.pipeline_mode<synchronous>, transform_indices = @transform_3, window_bounds = array<i64: 32, 64>}, {transform_indices = @transform_4, window_bounds = array<i64: 16, 32>}]} {
    %c0_i32 = arith.constant 0 : i32
    %0 = arith.cmpi eq, %arg0, %c0_i32 : i32
    %1 = arith.extui %0 : i1 to i32
    %c0_i32_0 = arith.constant 0 : i32
    %2 = arith.cmpi ne, %1, %c0_i32_0 : i32
    scf.if %2 {
      %c0_28 = arith.constant 0 : index
      %c0_29 = arith.constant 0 : index
      %97 = vector.load %arg2[%c0_28, %c0_29] : memref<2x32xf32, #tpu.memory_space<vmem>>, vector<2x32xf32>
      %c0_30 = arith.constant 0 : index
      %c0_31 = arith.constant 0 : index
      %98 = vector.load %arg6[%c0_30, %c0_31] : memref<2x32xf32, #tpu.memory_space<vmem>>, vector<2x32xf32>
      tpu.vector_store %arg6[%c0_30, %c0_31], %97 {strides = array<i32>} : memref<2x32xf32, #tpu.memory_space<vmem>>, vector<2x32xf32>,
    } else {
    }
    %c0 = arith.constant 0 : index
    %c0_1 = arith.constant 0 : index
    %3 = vector.load %arg1[%c0, %c0_1] : memref<16x16xf32, #tpu.memory_space<vmem>>, vector<16x16xf32>
    %c0_2 = arith.constant 0 : index
    %c0_3 = arith.constant 0 : index
    %4 = vector.load %arg3[%c0_2, %c0_3] : memref<16x65xf32, #tpu.memory_space<vmem>>, vector<16x65xf32>
    %cst = arith.constant dense<0.000000e+00> : vector<16x65xf32>
    %5 = tpu.matmul %3, %4, %cst {dimension_numbers = #tpu.dot_dimension_numbers<[1], [0], [0], [1], [0, 0, 1, 1], [], []>} : vector<16x16xf32>, vector<16x65xf32>, vector<16x65xf32> -> vector<16x65xf32>
    %6 = vector.extract_strided_slice %5 {offsets = [0, 64], sizes = [16, 1], strides = [1, 1]} : vector<16x65xf32> to vector<16x1xf32>
    %cst_4 = arith.constant 0.000000e+00 : f32
    %7 = vector.broadcast %cst_4 : f32 to vector<16x1xf32>
    %8 = arith.cmpf ogt, %6, %7 : vector<16x1xf32>
    %9 = vector.extract_strided_slice %5 {offsets = [0, 32], sizes = [16, 32], strides = [1, 1]} : vector<16x65xf32> to vector<16x32xf32>
    %10 = vector.extract_strided_slice %5 {offsets = [0, 0], sizes = [16, 32], strides = [1, 1]} : vector<16x65xf32> to vector<16x32xf32>
    %11 = vector.shape_cast %8 : vector<16x1xi1> to vector<16x1xi1>
    %12 = vector.broadcast %11 : vector<16x1xi1> to vector<16x32xi1>
    %13 = arith.select %12, %9, %10 : vector<16x32xi1>, vector<16x32xf32>
    %c0_5 = arith.constant 0 : index
    %c0_6 = arith.constant 0 : index
    %14 = vector.load %arg4[%c0_5, %c0_6] : memref<32x64xf32, #tpu.memory_space<vmem>>, vector<32x64xf32>
    %c0_7 = arith.constant 0 : index
    %c0_8 = arith.constant 0 : index
    %15 = vector.load %arg6[%c0_7, %c0_8] : memref<2x32xf32, #tpu.memory_space<vmem>>, vector<2x32xf32>
    %cst_9 = arith.constant dense<0.000000e+00> : vector<2x64xf32>
    %16 = tpu.matmul %15, %14, %cst_9 {dimension_numbers = #tpu.dot_dimension_numbers<[1], [0], [0], [1], [0, 0, 1, 1], [], []>} : vector<2x32xf32>, vector<32x64xf32>, vector<2x64xf32> -> vector<2x64xf32>
    %17 = vector.extract_strided_slice %13 {offsets = [0, 0], sizes = [2, 32], strides = [1, 1]} : vector<16x32xf32> to vector<2x32xf32>
    %18 = vector.extract_strided_slice %8 {offsets = [0, 0], sizes = [2, 1], strides = [1, 1]} : vector<16x1xi1> to vector<2x1xi1>
    %19 = vector.extract_strided_slice %16 {offsets = [0, 32], sizes = [2, 32], strides = [1, 1]} : vector<2x64xf32> to vector<2x32xf32>
    %20 = vector.extract_strided_slice %16 {offsets = [0, 0], sizes = [2, 32], strides = [1, 1]} : vector<2x64xf32> to vector<2x32xf32>
    %21 = vector.shape_cast %18 : vector<2x1xi1> to vector<2x1xi1>
    %22 = vector.broadcast %21 : vector<2x1xi1> to vector<2x32xi1>
    %23 = arith.select %22, %19, %20 : vector<2x32xi1>, vector<2x32xf32>
    %24 = arith.addf %17, %23 : vector<2x32xf32>
    %c0_10 = arith.constant 0 : index
    %c0_11 = arith.constant 0 : index
    %25 = vector.load %arg5[%c0_10, %c0_11] : memref<16x32xf32, #tpu.memory_space<vmem>>, vector<2x32xf32>
    tpu.vector_store %arg5[%c0_10, %c0_11], %24 {strides = array<i32>} : memref<16x32xf32, #tpu.memory_space<vmem>>, vector<2x32xf32>,
    %cst_12 = arith.constant dense<0.000000e+00> : vector<2x64xf32>
    %26 = tpu.matmul %24, %14, %cst_12 {dimension_numbers = #tpu.dot_dimension_numbers<[1], [0], [0], [1], [0, 0, 1, 1], [], []>} : vector<2x32xf32>, vector<32x64xf32>, vector<2x64xf32> -> vector<2x64xf32>
    %27 = vector.extract_strided_slice %13 {offsets = [2, 0], sizes = [2, 32], strides = [1, 1]} : vector<16x32xf32> to vector<2x32xf32>
    %28 = vector.extract_strided_slice %8 {offsets = [2, 0], sizes = [2, 1], strides = [1, 1]} : vector<16x1xi1> to vector<2x1xi1>
    %29 = vector.extract_strided_slice %26 {offsets = [0, 32], sizes = [2, 32], strides = [1, 1]} : vector<2x64xf32> to vector<2x32xf32>
    %30 = vector.extract_strided_slice %26 {offsets = [0, 0], sizes = [2, 32], strides = [1, 1]} : vector<2x64xf32> to vector<2x32xf32>
    %31 = vector.shape_cast %28 : vector<2x1xi1> to vector<2x1xi1>
    %32 = vector.broadcast %31 : vector<2x1xi1> to vector<2x32xi1>
    %33 = arith.select %32, %29, %30 : vector<2x32xi1>, vector<2x32xf32>
    %34 = arith.addf %27, %33 : vector<2x32xf32>
    %c2 = arith.constant 2 : index
    %c0_13 = arith.constant 0 : index
    %35 = vector.load %arg5[%c2, %c0_13] : memref<16x32xf32, #tpu.memory_space<vmem>>, vector<2x32xf32>
    tpu.vector_store %arg5[%c2, %c0_13], %34 {strides = array<i32>} : memref<16x32xf32, #tpu.memory_space<vmem>>, vector<2x32xf32>,
    %cst_14 = arith.constant dense<0.000000e+00> : vector<2x64xf32>
    %36 = tpu.matmul %34, %14, %cst_14 {dimension_numbers = #tpu.dot_dimension_numbers<[1], [0], [0], [1], [0, 0, 1, 1], [], []>} : vector<2x32xf32>, vector<32x64xf32>, vector<2x64xf32> -> vector<2x64xf32>
    %37 = vector.extract_strided_slice %13 {offsets = [4, 0], sizes = [2, 32], strides = [1, 1]} : vector<16x32xf32> to vector<2x32xf32>
    %38 = vector.extract_strided_slice %8 {offsets = [4, 0], sizes = [2, 1], strides = [1, 1]} : vector<16x1xi1> to vector<2x1xi1>
    %39 = vector.extract_strided_slice %36 {offsets = [0, 32], sizes = [2, 32], strides = [1, 1]} : vector<2x64xf32> to vector<2x32xf32>
    %40 = vector.extract_strided_slice %36 {offsets = [0, 0], sizes = [2, 32], strides = [1, 1]} : vector<2x64xf32> to vector<2x32xf32>
    %41 = vector.shape_cast %38 : vector<2x1xi1> to vector<2x1xi1>
    %42 = vector.broadcast %41 : vector<2x1xi1> to vector<2x32xi1>
    %43 = arith.select %42, %39, %40 : vector<2x32xi1>, vector<2x32xf32>
    %44 = arith.addf %37, %43 : vector<2x32xf32>
    %c4 = arith.constant 4 : index
    %c0_15 = arith.constant 0 : index
    %45 = vector.load %arg5[%c4, %c0_15] : memref<16x32xf32, #tpu.memory_space<vmem>>, vector<2x32xf32>
    tpu.vector_store %arg5[%c4, %c0_15], %44 {strides = array<i32>} : memref<16x32xf32, #tpu.memory_space<vmem>>, vector<2x32xf32>,
    %cst_16 = arith.constant dense<0.000000e+00> : vector<2x64xf32>
    %46 = tpu.matmul %44, %14, %cst_16 {dimension_numbers = #tpu.dot_dimension_numbers<[1], [0], [0], [1], [0, 0, 1, 1], [], []>} : vector<2x32xf32>, vector<32x64xf32>, vector<2x64xf32> -> vector<2x64xf32>
    %47 = vector.extract_strided_slice %13 {offsets = [6, 0], sizes = [2, 32], strides = [1, 1]} : vector<16x32xf32> to vector<2x32xf32>
    %48 = vector.extract_strided_slice %8 {offsets = [6, 0], sizes = [2, 1], strides = [1, 1]} : vector<16x1xi1> to vector<2x1xi1>
    %49 = vector.extract_strided_slice %46 {offsets = [0, 32], sizes = [2, 32], strides = [1, 1]} : vector<2x64xf32> to vector<2x32xf32>
    %50 = vector.extract_strided_slice %46 {offsets = [0, 0], sizes = [2, 32], strides = [1, 1]} : vector<2x64xf32> to vector<2x32xf32>
    %51 = vector.shape_cast %48 : vector<2x1xi1> to vector<2x1xi1>
    %52 = vector.broadcast %51 : vector<2x1xi1> to vector<2x32xi1>
    %53 = arith.select %52, %49, %50 : vector<2x32xi1>, vector<2x32xf32>
    %54 = arith.addf %47, %53 : vector<2x32xf32>
    %c6 = arith.constant 6 : index
    %c0_17 = arith.constant 0 : index
    %55 = vector.load %arg5[%c6, %c0_17] : memref<16x32xf32, #tpu.memory_space<vmem>>, vector<2x32xf32>
    tpu.vector_store %arg5[%c6, %c0_17], %54 {strides = array<i32>} : memref<16x32xf32, #tpu.memory_space<vmem>>, vector<2x32xf32>,
    %cst_18 = arith.constant dense<0.000000e+00> : vector<2x64xf32>
    %56 = tpu.matmul %54, %14, %cst_18 {dimension_numbers = #tpu.dot_dimension_numbers<[1], [0], [0], [1], [0, 0, 1, 1], [], []>} : vector<2x32xf32>, vector<32x64xf32>, vector<2x64xf32> -> vector<2x64xf32>
    %57 = vector.extract_strided_slice %13 {offsets = [8, 0], sizes = [2, 32], strides = [1, 1]} : vector<16x32xf32> to vector<2x32xf32>
    %58 = vector.extract_strided_slice %8 {offsets = [8, 0], sizes = [2, 1], strides = [1, 1]} : vector<16x1xi1> to vector<2x1xi1>
    %59 = vector.extract_strided_slice %56 {offsets = [0, 32], sizes = [2, 32], strides = [1, 1]} : vector<2x64xf32> to vector<2x32xf32>
    %60 = vector.extract_strided_slice %56 {offsets = [0, 0], sizes = [2, 32], strides = [1, 1]} : vector<2x64xf32> to vector<2x32xf32>
    %61 = vector.shape_cast %58 : vector<2x1xi1> to vector<2x1xi1>
    %62 = vector.broadcast %61 : vector<2x1xi1> to vector<2x32xi1>
    %63 = arith.select %62, %59, %60 : vector<2x32xi1>, vector<2x32xf32>
    %64 = arith.addf %57, %63 : vector<2x32xf32>
    %c8 = arith.constant 8 : index
    %c0_19 = arith.constant 0 : index
    %65 = vector.load %arg5[%c8, %c0_19] : memref<16x32xf32, #tpu.memory_space<vmem>>, vector<2x32xf32>
    tpu.vector_store %arg5[%c8, %c0_19], %64 {strides = array<i32>} : memref<16x32xf32, #tpu.memory_space<vmem>>, vector<2x32xf32>,
    %cst_20 = arith.constant dense<0.000000e+00> : vector<2x64xf32>
    %66 = tpu.matmul %64, %14, %cst_20 {dimension_numbers = #tpu.dot_dimension_numbers<[1], [0], [0], [1], [0, 0, 1, 1], [], []>} : vector<2x32xf32>, vector<32x64xf32>, vector<2x64xf32> -> vector<2x64xf32>
    %67 = vector.extract_strided_slice %13 {offsets = [10, 0], sizes = [2, 32], strides = [1, 1]} : vector<16x32xf32> to vector<2x32xf32>
    %68 = vector.extract_strided_slice %8 {offsets = [10, 0], sizes = [2, 1], strides = [1, 1]} : vector<16x1xi1> to vector<2x1xi1>
    %69 = vector.extract_strided_slice %66 {offsets = [0, 32], sizes = [2, 32], strides = [1, 1]} : vector<2x64xf32> to vector<2x32xf32>
    %70 = vector.extract_strided_slice %66 {offsets = [0, 0], sizes = [2, 32], strides = [1, 1]} : vector<2x64xf32> to vector<2x32xf32>
    %71 = vector.shape_cast %68 : vector<2x1xi1> to vector<2x1xi1>
    %72 = vector.broadcast %71 : vector<2x1xi1> to vector<2x32xi1>
    %73 = arith.select %72, %69, %70 : vector<2x32xi1>, vector<2x32xf32>
    %74 = arith.addf %67, %73 : vector<2x32xf32>
    %c10 = arith.constant 10 : index
    %c0_21 = arith.constant 0 : index
    %75 = vector.load %arg5[%c10, %c0_21] : memref<16x32xf32, #tpu.memory_space<vmem>>, vector<2x32xf32>
    tpu.vector_store %arg5[%c10, %c0_21], %74 {strides = array<i32>} : memref<16x32xf32, #tpu.memory_space<vmem>>, vector<2x32xf32>,
    %cst_22 = arith.constant dense<0.000000e+00> : vector<2x64xf32>
    %76 = tpu.matmul %74, %14, %cst_22 {dimension_numbers = #tpu.dot_dimension_numbers<[1], [0], [0], [1], [0, 0, 1, 1], [], []>} : vector<2x32xf32>, vector<32x64xf32>, vector<2x64xf32> -> vector<2x64xf32>
    %77 = vector.extract_strided_slice %13 {offsets = [12, 0], sizes = [2, 32], strides = [1, 1]} : vector<16x32xf32> to vector<2x32xf32>
    %78 = vector.extract_strided_slice %8 {offsets = [12, 0], sizes = [2, 1], strides = [1, 1]} : vector<16x1xi1> to vector<2x1xi1>
    %79 = vector.extract_strided_slice %76 {offsets = [0, 32], sizes = [2, 32], strides = [1, 1]} : vector<2x64xf32> to vector<2x32xf32>
    %80 = vector.extract_strided_slice %76 {offsets = [0, 0], sizes = [2, 32], strides = [1, 1]} : vector<2x64xf32> to vector<2x32xf32>
    %81 = vector.shape_cast %78 : vector<2x1xi1> to vector<2x1xi1>
    %82 = vector.broadcast %81 : vector<2x1xi1> to vector<2x32xi1>
    %83 = arith.select %82, %79, %80 : vector<2x32xi1>, vector<2x32xf32>
    %84 = arith.addf %77, %83 : vector<2x32xf32>
    %c12 = arith.constant 12 : index
    %c0_23 = arith.constant 0 : index
    %85 = vector.load %arg5[%c12, %c0_23] : memref<16x32xf32, #tpu.memory_space<vmem>>, vector<2x32xf32>
    tpu.vector_store %arg5[%c12, %c0_23], %84 {strides = array<i32>} : memref<16x32xf32, #tpu.memory_space<vmem>>, vector<2x32xf32>,
    %cst_24 = arith.constant dense<0.000000e+00> : vector<2x64xf32>
    %86 = tpu.matmul %84, %14, %cst_24 {dimension_numbers = #tpu.dot_dimension_numbers<[1], [0], [0], [1], [0, 0, 1, 1], [], []>} : vector<2x32xf32>, vector<32x64xf32>, vector<2x64xf32> -> vector<2x64xf32>
    %87 = vector.extract_strided_slice %13 {offsets = [14, 0], sizes = [2, 32], strides = [1, 1]} : vector<16x32xf32> to vector<2x32xf32>
    %88 = vector.extract_strided_slice %8 {offsets = [14, 0], sizes = [2, 1], strides = [1, 1]} : vector<16x1xi1> to vector<2x1xi1>
    %89 = vector.extract_strided_slice %86 {offsets = [0, 32], sizes = [2, 32], strides = [1, 1]} : vector<2x64xf32> to vector<2x32xf32>
    %90 = vector.extract_strided_slice %86 {offsets = [0, 0], sizes = [2, 32], strides = [1, 1]} : vector<2x64xf32> to vector<2x32xf32>
    %91 = vector.shape_cast %88 : vector<2x1xi1> to vector<2x1xi1>
    %92 = vector.broadcast %91 : vector<2x1xi1> to vector<2x32xi1>
    %93 = arith.select %92, %89, %90 : vector<2x32xi1>, vector<2x32xf32>
    %94 = arith.addf %87, %93 : vector<2x32xf32>
    %c14 = arith.constant 14 : index
    %c0_25 = arith.constant 0 : index
    %95 = vector.load %arg5[%c14, %c0_25] : memref<16x32xf32, #tpu.memory_space<vmem>>, vector<2x32xf32>
    tpu.vector_store %arg5[%c14, %c0_25], %94 {strides = array<i32>} : memref<16x32xf32, #tpu.memory_space<vmem>>, vector<2x32xf32>,
    %c0_26 = arith.constant 0 : index
    %c0_27 = arith.constant 0 : index
    %96 = vector.load %arg6[%c0_26, %c0_27] : memref<2x32xf32, #tpu.memory_space<vmem>>, vector<2x32xf32>
    tpu.vector_store %arg6[%c0_26, %c0_27], %94 {strides = array<i32>} : memref<2x32xf32, #tpu.memory_space<vmem>>, vector<2x32xf32>,
    return
  }
  func.func @transform_0(%arg0: i32) -> (i32, i32) {
    %c0_i32 = arith.constant 0 : i32
    %c0_i32_0 = arith.constant 0 : i32
    return %arg0, %c0_i32 : i32, i32
  }
  func.func @transform_1(%arg0: i32) -> (i32, i32) {
    %c0_i32 = arith.constant 0 : i32
    %c0_i32_0 = arith.constant 0 : i32
    %c0_i32_1 = arith.constant 0 : i32
    return %c0_i32, %c0_i32_0 : i32, i32
  }
  func.func @transform_2(%arg0: i32) -> (i32, i32) {
    %c0_i32 = arith.constant 0 : i32
    %c0_i32_0 = arith.constant 0 : i32
    %c0_i32_1 = arith.constant 0 : i32
    return %c0_i32, %c0_i32_0 : i32, i32
  }
  func.func @transform_3(%arg0: i32) -> (i32, i32) {
    %c0_i32 = arith.constant 0 : i32
    %c0_i32_0 = arith.constant 0 : i32
    %c0_i32_1 = arith.constant 0 : i32
    return %c0_i32, %c0_i32_0 : i32, i32
  }
  func.func @transform_4(%arg0: i32) -> (i32, i32) {
    %c0_i32 = arith.constant 0 : i32
    %c0_i32_0 = arith.constant 0 : i32
    return %arg0, %c0_i32 : i32, i32
  }
}

</mosaic_0001>

<bundles_post_ra>
// kernel: tpu_custom_call.1
= control target key start
LH: loop header
LB: loop body
LE: loop exit
PB: predicated region body
PF: predicated region fallthrough
CT: control target
= control target key end

     0   :  { %9 = vsyncpa [#allocation4], 0  ;;  %s1462_s0 = inlined_call_operand.hbm [shape: f32[16,16], index: 0, kind: input, shape index: {}]   ;;  %s1463_s1 = inlined_call_operand.vmem [shape: f32[2,32], index: 1, kind: input, shape index: {}]   ;;  %s1464_s2 = inlined_call_operand.hbm [shape: f32[16,65], index: 2, kind: input, shape index: {}]   ;;  %s1465_s3 = inlined_call_operand.hbm [shape: f32[32,64], index: 3, kind: input, shape index: {}]   ;;  %s1466_s4 = inlined_call_operand.hbm [shape: f32[16,32], index: 4, kind: output, shape index: {}]  }
   0x1   :  { %10 = vsyncpa [#allocation7], 0 }
   0x2   :  { %11 = vsyncpa [#allocation5], 0  ;;  %s1229_s15 = smov [#allocation6]   ;;  %s1230_s17 = smov [#allocation3]  }
   0x3   :  { %s31_s16 = sshll.u32 %s1229_s15, 4  ;;  %s17_s18 = sshll.u32 %s1230_s17, 4  ;;  %s32_s16 = int_to_ptr.vmem [resolvable:$true] %s31_s16  ;;  %s1267_s18 = int_to_ptr.vmem [resolvable:$true] %s17_s18 }
   0x4   :  { %s1135_s21 = scalar_lea.hbm %s1464_s2, 256 }
   0x5   :  { %p1136_p0 = scmp.ne.s32.totalorder %s1464_s2, %s1135_s21  ;;  %p1139_p1 = scmp.lt.u32.totalorder %s1135_s21, %s1464_s2 }
   0x7   :  { %p1141_p2 = pnand %p1139_p1, %p1136_p0 }
   0x9   :  { %1144 = shalt.err (!%p1141_p2)
}
   0xa   :  { %s1145_s26 = scalar_lea.vmem %s32_s16, 256  ;;  %p1150_p4 = scmp.lt.s32.totalorder %s32_s16, %s32_s16 }
   0xb   :  { %p1146_p3 = scmp.ne.s32.totalorder %s32_s16, %s1145_s26  ;;  %p1151_p5 = scmp.lt.s32.totalorder %s1145_s26, %s1145_s26 }
   0xd   :  { %p1152_p6 = por %p1151_p5, %p1150_p4 }
   0xf   :  { %p1153_p7 = pnand %p1152_p6, %p1146_p3 }
  0x11   :  { %1156 = shalt.err (!%p1153_p7)
}
  0x12   :  { %s1231_s27 = smov 128   ;;  %s1232_s28 = smov 8  }
  0x13   :  { %37 = dma.hbm_to_vmem [thread:$0]  %s1464_s2, 256, %s32_s16, [#allocation7], %s1231_s27, %s1231_s27, %s1232_s28  }
  0x14   :  { %s1157_s7 = scalar_lea.hbm %s1462_s0, 256 }
  0x15   :  { %p1158_p8 = scmp.ne.s32.totalorder %s1462_s0, %s1157_s7  ;;  %p1161_p9 = scmp.lt.u32.totalorder %s1157_s7, %s1462_s0 }
  0x17   :  { %p1163_p10 = pnand %p1161_p9, %p1158_p8 }
  0x19   :  { %1166 = shalt.err (!%p1163_p10)
}
  0x1a   :  { %s1167_s12 = scalar_lea.vmem %s1267_s18, 256  ;;  %p1172_p12 = scmp.lt.s32.totalorder %s1267_s18, %s1267_s18 }
  0x1b   :  { %p1168_p11 = scmp.ne.s32.totalorder %s1267_s18, %s1167_s12  ;;  %p1173_p13 = scmp.lt.s32.totalorder %s1167_s12, %s1167_s12 }
  0x1d   :  { %p1174_p0 = por %p1173_p13, %p1172_p12 }
  0x1f   :  { %p1175_p1 = pnand %p1174_p0, %p1168_p11 }
  0x21   :  { %1178 = shalt.err (!%p1175_p1)
}
  0x22   :  { %23 = dma.hbm_to_vmem [thread:$0]  %s1462_s0, 256, %s1267_s18, [#allocation4], %s1231_s27, %s1231_s27, %s1232_s28  }
  0x23   :  { %s1233_s14 = smov [#allocation8]   ;;  %s1179_s19 = scalar_lea.hbm %s1465_s3, 512 }
  0x24   :  { %s43_s15 = sshll.u32 %s1233_s14, 4  ;;  %p1180_p2 = scmp.ne.s32.totalorder %s1465_s3, %s1179_s19  ;;  %s44_s15 = int_to_ptr.vmem [resolvable:$true] %s43_s15 }
  0x25   :  { %p1183_p3 = scmp.lt.u32.totalorder %s1179_s19, %s1465_s3 }
  0x27   :  { %p1185_p4 = pnand %p1183_p3, %p1180_p2 }
  0x29   :  { %1188 = shalt.err (!%p1185_p4)
}
  0x2a   :  { %s1189_s24 = scalar_lea.vmem %s44_s15, 512  ;;  %p1194_p6 = scmp.lt.s32.totalorder %s44_s15, %s44_s15 }
  0x2b   :  { %p1190_p5 = scmp.ne.s32.totalorder %s44_s15, %s1189_s24  ;;  %p1195_p7 = scmp.lt.s32.totalorder %s1189_s24, %s1189_s24 }
  0x2d   :  { %p1196_p8 = por %p1195_p7, %p1194_p6 }
  0x2f   :  { %p1197_p9 = pnand %p1196_p8, %p1190_p5 }
  0x31   :  { %1200 = shalt.err (!%p1197_p9)
}
  0x32   :  { %49 = dma.hbm_to_vmem [thread:$0]  %s1465_s3, 512, %s44_s15, [#allocation7], %s1231_s27, %s1231_s27, %s1232_s28  }
  0x33   :  { %1223 = dma.done.wait [#allocation4], 256  }
  0x34   :  { %1224 = vsyncadd [#allocation4], 4294967040 }
  0x35   :  { %1225 = dma.done.wait [#allocation7], 768  }
  0x36   :  { %1226 = vsyncadd [#allocation7], 4294966528  ;;  %v1234_v0 = vmov 0.0|0.0   ;;  %vm1235_vm0 = vmmov 0   ;;  %v1236_v1 = vmov 0.0   ;;  %vm70_vm1 = vcmask 130048  }
  0x37   :  { %1072 = vmatprep.subr.bf16.mxu1 %v1234_v0  ;;  %988 = vmatprep.mubr.msk.f32.mxu1 %vm1235_vm0, %v1236_v1  ;;  %v68_v2 = vld [vmem:[#allocation6] sm:$0xff]  ;;  %v69_v3 = vld [vmem:[#allocation6 + $0x8] sm:$0xff]  ;;  %v66_v4 = vld [vmem:[#allocation3] sm:$0xff]  ;;  %vm64_vm2 = vcmask 254976   ;;  %vm179_vm3 = vcmask 261120   ;;  %v1237_v15 = vmov 64  }
  0x38   :  { %v1068_v5 = vpack.c.bf16 %v69_v3, %v68_v2  ;;  %977 = vmatprep.mubr.msk.f32.mxu0 %vm70_vm1, %v66_v4  ;;  %v174_v6 = vld [vmem:[#allocation8] sm:$0xff]  ;;  %v175_v7 = vld [vmem:[#allocation8 + $0x8] sm:$0xff]  ;;  %v176_v9 = vld [vmem:[#allocation8 + $0x10] sm:$0xff]  ;;  %1133 = vset.pattern.permute.xlu0 %v1237_v15  ;;  %v1238_v18 = vmov 0   ;;  %s1240_s26 = smov 96   ;;  %vm353_vm8 = vcmask 257026  }
  0x39   :  { %v1323_v8 = vpack.c.bf16 %v175_v7, %v174_v6  ;;  %v177_v10 = vld [vmem:[#allocation8 + $0x18] sm:$0xff]  ;;  %v67_v12 = vld [vmem:[#allocation3 + $0x8] sm:$0xff]  ;;  %1134 = vset.pattern.permute.xlu1 %v1237_v15  ;;  %vm539_vm9 = vcmask 261126   ;;  %vm446_vm10 = vcmask 259076   ;;  %s1241_s29 = smov [#allocation9]  }
  0x3a   :  { %v63_v11 = vld [vmem:[%s1463_s1] sm:$0x3]  ;;  %1069 = vmatprep.subr.bf16.mxu0 %v1068_v5  ;;  %v1330_v13 = vpack.c.bf16 %v177_v10, %v176_v9  ;;  %s1239_s1 = smov 32   ;;  %s906_s30 = sshll.u32 %s1241_s29, 4  ;;  %s907_s30 = int_to_ptr.vmem [resolvable:$true] %s906_s30 }
  0x3b   :  { %65 = vst.msk [vmem:[#allocation2] sm:$0x3] %vm64_vm2, %v63_v11  ;;  %1071 = vmatpush3.bf16.msra.mxu0 %v1068_v5  ;;  %1074 = vmatpush3.bf16.msra.mxu1 %v1323_v8  ;;  %s1201_s5 = scalar_lea.vmem %s907_s30, 256  ;;  %p1206_p11 = scmp.lt.s32.totalorder %s907_s30, %s907_s30 }
  0x3c   :  { %1075 = vmatprep.subr.bf16.mxu1 %v1234_v0  ;;  %1078 = vmatprep.subr.bf16.mxu0 %v1234_v0  ;;  %p1202_p10 = scmp.ne.s32.totalorder %s907_s30, %s1201_s5  ;;  %p1207_p12 = scmp.lt.s32.totalorder %s1201_s5, %s1201_s5 }
  0x3e   :  { %978 = vmatmul.mubr.msk.f32.vlgmr.msra.gmra.mrb[0].mxu0 %vm70_vm1, %v67_v12  ;;  %p1208_p13 = por %p1207_p12, %p1206_p11 }
  0x3f   :  { %1077 = vmatpush3.bf16.msra.mxu1 %v1330_v13  ;;  %1080 = vmatpush3.bf16.msra.mxu0 %v1323_v8 }
  0x40   :  { %1081 = vmatprep.subr.bf16.mxu0 %v1234_v0  ;;  %999 = vmatprep.mubr.msk.f32.mxu0 %vm1235_vm0, %v1236_v1  ;;  %p1209_p0 = pnand %p1208_p13, %p1202_p10 }
  0x41   :  { %1084 = vmatprep.subr.bf16.mxu1 %v1234_v0 }
  0x42   :  { %v178_v14 = vld [vmem:[#allocation2] sm:$0x3] }
  0x43   :  { %989 = vmatmul.mubr.msk.f32.vlgmr.msra.gmra.mrb[0].mxu1 %vm179_vm3, %v178_v14  ;;  %1083 = vmatpush3.bf16.msra.mxu0 %v1330_v13 }
  0x44   :  { %1086 = vmatpush3.bf16.msra.mxu1 %v1323_v8  ;;  %1010 = vmatprep.mubr.msk.f32.mxu1 %vm1235_vm0, %v1236_v1 }
  0x45   :  { %1087 = vmatprep.subr.bf16.mxu1 %v1234_v0  ;;  %1090 = vmatprep.subr.bf16.mxu0 %v1234_v0 }
  0x48   :  { %1089 = vmatpush3.bf16.msra.mxu1 %v1330_v13 }
  0x49   :  { %1096 = vmatprep.subr.bf16.mxu1 %v1234_v0 }
 0x111   :  { %v1350_v16 = vpop.f32.mrb[0].mxu0 }
 0x112   :  { %v143_v17 = vpop.f32.mrb[1].mxu0  ;;  %vm153_vm4 = vcmp.gt.f32.partialorder %v1350_v16, 0.0 }
 0x113   :  { %vm152_vm5 = vcmp.gt.f32.partialorder %v143_v17, 0.0  ;;  %v1353_v19 = vsel %vm153_vm4, 1, %v1238_v18 }
 0x114   :  { %v154_v20 = vsel %vm152_vm5, 1, %v1238_v18 }
 0x115   :  { %157 = vperm.xlu0 %1133, %v154_v20  }
 0x116   :  { %v249_v21 = vpop.f32.mrb[0].mxu1 }
 0x117   :  { %254 = vrot.lane.b32.xlu1 %v249_v21, %s1239_s1  ;;  %v990_v22 = vpop.f32.mrb[1].mxu1 }
 0x119   :  { %166 = vrot.lane.b32.xlu0 %v143_v17, %s1239_s1 }
 0x189   :  { %v255_v24 = vpop.permute.xlu1 %254 }
 0x194   :  { %v158_v23 = vpop.permute.xlu0 %157 }
 0x195   :  { %vm162_vm6 = vcmp.eq.s32.totalorder %v158_v23, 1 }
 0x196   :  { %v257_v26 = vsel %vm162_vm6, %v249_v21, %v255_v24 }
 0x198   :  { %v167_v25 = vpop.permute.xlu0 %166 }
 0x199   :  { %v172_v27 = vsel %vm162_vm6, %v143_v17, %v167_v25 }
 0x19a   :  { %v258_v28 = vadd.f32 %v257_v26, %v172_v27 }
 0x19c   :  { %260 = vrot.lane.b32.xlu1 %v258_v28, %s1240_s26 }
 0x20e   :  { %v261_v29 = vpop.permute.xlu1 %260 }
 0x20f   :  { %264 = vst.msk [vmem:[#allocation9] sm:$0x3] %vm64_vm2, %v261_v29  ;;  %1000 = vmatmul.mubr.msk.f32.vlgmr.msra.gmra.mrb[2].mxu0 %vm179_vm3, %v261_v29 }
 0x210   :  { %1092 = vmatpush3.bf16.msra.mxu0 %v1323_v8  ;;  %1021 = vmatprep.mubr.msk.f32.mxu0 %vm1235_vm0, %v1236_v1 }
 0x211   :  { %1093 = vmatprep.subr.bf16.mxu0 %v1234_v0 }
 0x214   :  { %1095 = vmatpush3.bf16.msra.mxu0 %v1330_v13 }
 0x215   :  { %1102 = vmatprep.subr.bf16.mxu0 %v1234_v0 }
 0x2e2   :  { %v333_v30 = vpop.f32.mrb[2].mxu0 }
 0x2e3   :  { %v338_v31 = vrot.slane %v333_v30, 6  ;;  %v1001_v32 = vpop.f32.mrb[3].mxu0 }
 0x2e5   :  { %339 = vrot.lane.b32.xlu0 %v338_v31, %s1240_s26 }
 0x357   :  { %v340_v33 = vpop.permute.xlu0 %339 }
 0x358   :  { %v343_v34 = vsel %vm162_vm6, %v340_v33, %v338_v31 }
 0x359   :  { %345 = vrot.lane.b32.xlu1 %v343_v34, %s1239_s1 }
 0x3cb   :  { %v346_v35 = vpop.permute.xlu1 %345 }
 0x3cc   :  { %v1371_v36 = vadd.f32 %v346_v35, %v172_v27 }
 0x3ce   :  { %v355_v37 = vrot.slane %v1371_v36, 2 }
 0x3d0   :  { %356 = vrot.lane.b32.xlu0 %v355_v37, %s1240_s26 }
 0x442   :  { %v357_v38 = vpop.permute.xlu0 %356 }
 0x443   :  { %1011 = vmatmul.mubr.msk.f32.vlgmr.msra.gmra.mrb[2].mxu1 %vm179_vm3, %v357_v38 }
 0x444   :  { %1098 = vmatpush3.bf16.msra.mxu1 %v1323_v8  ;;  %1032 = vmatprep.mubr.msk.f32.mxu1 %vm1235_vm0, %v1236_v1 }
 0x445   :  { %1099 = vmatprep.subr.bf16.mxu1 %v1234_v0 }
 0x448   :  { %1101 = vmatpush3.bf16.msra.mxu1 %v1330_v13 }
 0x449   :  { %1108 = vmatprep.subr.bf16.mxu1 %v1234_v0 }
 0x516   :  { %v426_v39 = vpop.f32.mrb[2].mxu1 }
 0x517   :  { %v431_v40 = vrot.slane %v426_v39, 4  ;;  %v1012_v41 = vpop.f32.mrb[3].mxu1 }
 0x519   :  { %432 = vrot.lane.b32.xlu1 %v431_v40, %s1240_s26 }
 0x58b   :  { %v433_v42 = vpop.permute.xlu1 %432 }
 0x58c   :  { %v436_v43 = vsel %vm162_vm6, %v433_v42, %v431_v40 }
 0x58d   :  { %438 = vrot.lane.b32.xlu0 %v436_v43, %s1239_s1 }
 0x5ff   :  { %v439_v44 = vpop.permute.xlu0 %438 }
 0x600   :  { %v1385_v45 = vadd.f32 %v439_v44, %v172_v27 }
 0x602   :  { %v448_v46 = vrot.slane %v1385_v45, 4 }
 0x604   :  { %449 = vrot.lane.b32.xlu1 %v448_v46, %s1240_s26 }
 0x676   :  { %v450_v47 = vpop.permute.xlu1 %449 }
 0x677   :  { %1022 = vmatmul.mubr.msk.f32.vlgmr.msra.gmra.mrb[4].mxu0 %vm179_vm3, %v450_v47 }
 0x678   :  { %1104 = vmatpush3.bf16.msra.mxu0 %v1323_v8  ;;  %1043 = vmatprep.mubr.msk.f32.mxu0 %vm1235_vm0, %v1236_v1 }
 0x679   :  { %1105 = vmatprep.subr.bf16.mxu0 %v1234_v0 }
 0x67c   :  { %1107 = vmatpush3.bf16.msra.mxu0 %v1330_v13 }
 0x67d   :  { %1114 = vmatprep.subr.bf16.mxu0 %v1234_v0 }
 0x74a   :  { %v519_v48 = vpop.f32.mrb[4].mxu0 }
 0x74b   :  { %v524_v49 = vrot.slane %v519_v48, 2  ;;  %v1023_v50 = vpop.f32.mrb[5].mxu0 }
 0x74d   :  { %525 = vrot.lane.b32.xlu0 %v524_v49, %s1240_s26 }
 0x7bf   :  { %v526_v51 = vpop.permute.xlu0 %525 }
 0x7c0   :  { %v529_v52 = vsel %vm162_vm6, %v526_v51, %v524_v49 }
 0x7c1   :  { %531 = vrot.lane.b32.xlu1 %v529_v52, %s1239_s1 }
 0x7c5   :  { %160 = vperm.xlu1 %1134, %v1353_v19  }
 0x833   :  { %v532_v53 = vpop.permute.xlu1 %531 }
 0x834   :  { %v534_v54 = vadd.f32 %v532_v53, %v172_v27 }
 0x836   :  { %v541_v55 = vrot.slane %v534_v54, 6 }
 0x838   :  { %542 = vrot.lane.b32.xlu0 %v541_v55, %s1240_s26 }
 0x83c   :  { %168 = vrot.lane.b32.xlu0 %v1350_v16, %s1239_s1 }
 0x844   :  { %v161_v59 = vpop.permute.xlu1 %160 }
 0x845   :  { %vm163_vm7 = vcmp.eq.s32.totalorder %v161_v59, 1 }
 0x8aa   :  { %v543_v56 = vpop.permute.xlu0 %542 }
 0x8ab   :  { %1033 = vmatmul.mubr.msk.f32.vlgmr.msra.gmra.mrb[4].mxu1 %vm179_vm3, %v543_v56 }
 0x8ac   :  { %1110 = vmatpush3.bf16.msra.mxu1 %v1323_v8  ;;  %1054 = vmatprep.mubr.msk.f32.mxu1 %vm1235_vm0, %v1236_v1 }
 0x8ad   :  { %1111 = vmatprep.subr.bf16.mxu1 %v1234_v0 }
 0x8ae   :  { %v169_v60 = vpop.permute.xlu0 %168 }
 0x8af   :  { %v173_v62 = vsel %vm163_vm7, %v1350_v16, %v169_v60 }
 0x8b0   :  { %1113 = vmatpush3.bf16.msra.mxu1 %v1330_v13 }
 0x97e   :  { %v612_v57 = vpop.f32.mrb[4].mxu1 }
 0x97f   :  { %617 = vrot.lane.b32.xlu1 %v612_v57, %s1239_s1  ;;  %v1034_v58 = vpop.f32.mrb[5].mxu1 }
 0x9f1   :  { %v618_v61 = vpop.permute.xlu1 %617 }
 0x9f2   :  { %v620_v63 = vsel %vm163_vm7, %v612_v57, %v618_v61 }
 0x9f3   :  { %v621_v2 = vadd.f32 %v620_v63, %v173_v62 }
 0x9f5   :  { %623 = vrot.lane.b32.xlu0 %v621_v2, %s1240_s26 }
 0xa67   :  { %v624_v3 = vpop.permute.xlu0 %623 }
 0xa68   :  { %626 = vst.msk [vmem:[#allocation9 + $0x8] sm:$0x3] %vm64_vm2, %v624_v3  ;;  %1044 = vmatmul.mubr.msk.f32.vlgmr.msra.gmra.mrb[6].mxu0 %vm179_vm3, %v624_v3 }
 0xa69   :  { %1116 = vmatpush3.bf16.msra.mxu0 %v1323_v8  ;;  %1065 = vmatprep.mubr.msk.f32.mxu0 %vm1235_vm0, %v1236_v1 }
 0xa6a   :  { %1117 = vmatprep.subr.bf16.mxu0 %v1234_v0 }
 0xa6d   :  { %1119 = vmatpush3.bf16.msra.mxu0 %v1330_v13 }
 0xb3b   :  { %v695_v4 = vpop.f32.mrb[6].mxu0 }
 0xb3c   :  { %v700_v5 = vrot.slane %v695_v4, 6  ;;  %v1045_v6 = vpop.f32.mrb[7].mxu0 }
 0xb3e   :  { %701 = vrot.lane.b32.xlu1 %v700_v5, %s1240_s26 }
 0xbb0   :  { %v702_v7 = vpop.permute.xlu1 %701 }
 0xbb1   :  { %v705_v9 = vsel %vm163_vm7, %v702_v7, %v700_v5 }
 0xbb2   :  { %707 = vrot.lane.b32.xlu0 %v705_v9, %s1239_s1 }
 0xc24   :  { %v708_v10 = vpop.permute.xlu0 %707 }
 0xc25   :  { %v710_v11 = vadd.f32 %v708_v10, %v173_v62 }
 0xc27   :  { %v716_v8 = vrot.slane %v710_v11, 2 }
 0xc29   :  { %717 = vrot.lane.b32.xlu1 %v716_v8, %s1240_s26 }
 0xc9b   :  { %v718_v1 = vpop.permute.xlu1 %717 }
 0xc9c   :  { %1055 = vmatmul.mubr.msk.f32.vlgmr.msra.gmra.mrb[6].mxu1 %vm179_vm3, %v718_v1 }
 0xd6f   :  { %v787_v0 = vpop.f32.mrb[6].mxu1 }
 0xd70   :  { %v792_v12 = vrot.slane %v787_v0, 4  ;;  %v1056_v13 = vpop.f32.mrb[7].mxu1 }
 0xd72   :  { %793 = vrot.lane.b32.xlu0 %v792_v12, %s1240_s26 }
 0xde4   :  { %v794_v14 = vpop.permute.xlu0 %793 }
 0xde5   :  { %v797_v15 = vsel %vm163_vm7, %v794_v14, %v792_v12 }
 0xde6   :  { %799 = vrot.lane.b32.xlu1 %v797_v15, %s1239_s1 }
 0xe58   :  { %v800_v16 = vpop.permute.xlu1 %799 }
 0xe59   :  { %v802_v17 = vadd.f32 %v800_v16, %v173_v62 }
 0xe5b   :  { %v808_v18 = vrot.slane %v802_v17, 4 }
 0xe5d   :  { %809 = vrot.lane.b32.xlu0 %v808_v18, %s1240_s26 }
 0xecf   :  { %v810_v19 = vpop.permute.xlu0 %809 }
 0xed0   :  { %1066 = vmatmul.mubr.msk.f32.vlgmr.msra.gmra.mrb[8].mxu0 %vm179_vm3, %v810_v19 }
 0xfa3   :  { %v879_v20 = vpop.f32.mrb[8].mxu0 }
 0xfa4   :  { %v884_v21 = vrot.slane %v879_v20, 2  ;;  %v1067_v22 = vpop.f32.mrb[9].mxu0 }
 0xfa6   :  { %885 = vrot.lane.b32.xlu1 %v884_v21, %s1240_s26 }
 0xfaa   :  { %350 = vrot.lane.b32.xlu1 %v1371_v36, %s1240_s26 }
 0xfae   :  { %536 = vrot.lane.b32.xlu1 %v534_v54, %s1240_s26 }
 0xfb2   :  { %804 = vrot.lane.b32.xlu1 %v802_v17, %s1240_s26 }
0x1018   :  { %v886_v23 = vpop.permute.xlu1 %885 }
0x1019   :  { %v889_v24 = vsel %vm163_vm7, %v886_v23, %v884_v21 }
0x101a   :  { %891 = vrot.lane.b32.xlu0 %v889_v24, %s1239_s1 }
0x101c   :  { %v351_v25 = vpop.permute.xlu1 %350 }
0x101d   :  { %354 = vst.msk [vmem:[#allocation9] sm:$0xc] %vm353_vm8, %v351_v25 }
0x101e   :  { %443 = vrot.lane.b32.xlu0 %v1385_v45, %s1240_s26 }
0x1020   :  { %v537_v26 = vpop.permute.xlu1 %536 }
0x1021   :  { %540 = vst.msk [vmem:[#allocation9] sm:$0xc0] %vm539_vm9, %v537_v26 }
0x1022   :  { %712 = vrot.lane.b32.xlu0 %v710_v11, %s1240_s26 }
0x1024   :  { %v805_v27 = vpop.permute.xlu1 %804 }
0x1025   :  { %807 = vst.msk [vmem:[#allocation9 + $0x8] sm:$0x30] %vm446_vm10, %v805_v27 }
0x108c   :  { %v892_v28 = vpop.permute.xlu0 %891 }
0x108d   :  { %v894_v29 = vadd.f32 %v892_v28, %v173_v62 }
0x108f   :  { %896 = vrot.lane.b32.xlu0 %v894_v29, %s1240_s26 }
0x1090   :  { %v444_v30 = vpop.permute.xlu0 %443 }
0x1091   :  { %447 = vst.msk [vmem:[#allocation9] sm:$0x30] %vm446_vm10, %v444_v30 }
0x1094   :  { %v713_v31 = vpop.permute.xlu0 %712 }
0x1095   :  { %715 = vst.msk [vmem:[#allocation9 + $0x8] sm:$0xc] %vm353_vm8, %v713_v31 }
0x1101   :  { %v897_v32 = vpop.permute.xlu0 %896 }
0x1102   :  { %899 = vst.msk [vmem:[#allocation9 + $0x8] sm:$0xc0] %vm539_vm9, %v897_v32  ;;  %900 = vst.msk [vmem:[#allocation2 - $0x6] sm:$0xc0] %vm539_vm9, %v897_v32 }
0x1103   :  { %1212 = shalt.err (!%p1209_p0)
}
0x1104   :  { %s1213_s8 = scalar_lea.hbm %s1466_s4, 256 }
0x1105   :  { %p1214_p1 = scmp.ne.s32.totalorder %s1466_s4, %s1213_s8  ;;  %p1217_p2 = scmp.lt.u32.totalorder %s1213_s8, %s1466_s4 }
0x1107   :  { %p1219_p3 = pnand %p1217_p2, %p1214_p1 }
0x1109   :  { %1222 = shalt.err (!%p1219_p3)
}
0x110a   :  { %912 = dma.vmem_to_hbm [thread:$0]  %s907_s30, 256, %s1466_s4, [#allocation5], %s1231_s27, %s1231_s27, %s1232_s28  }
0x110b   :  { %1227 = dma.done.wait [#allocation5], 256  }
0x110c   :  { %1228 = vsyncadd [#allocation5], 4294967040 }
0x110d   :  { %916 = vsyncpa [#allocation4], 1 }
0x110e   :  { %917 = vsyncpa [#allocation7], 1 }
0x110f   :  { %918 = vsyncpa [#allocation5], 1 }

</bundles_post_ra>
